<compile_context>
chip_gen: v5e
topology: v5e:2x2
jax: 0.10.0
libtpu: 0.0.40
codegen_flags: <defaults>
</compile_context>

<pallas_src>
import jax
import jax.numpy as jnp
from jax.experimental import pallas as pl
from jax.experimental.pallas import tpu as pltpu


_LANES = 128
_SUBLANES = 8


def _round_up(x, m):
    return ((x + m - 1) // m) * m


def _round_down(x, m):
    return (x // m) * m


def _default_vmem_limit_bytes():
    """~64 MiB on v5e/v6e (128 MiB physical VMEM), 32 MiB on v7x (64 MiB physical)."""
    cap = None
    try:
        cap = getattr(pltpu.get_tpu_info(), "vmem_capacity_bytes", None)
    except Exception:
        cap = None
    if not cap:
        return 32 * 1024 * 1024
    return int(min(max(cap // 2, 32 * 1024 * 1024), 64 * 1024 * 1024))


def _single_block_kernel(hw_total):
    """Whole spatial extent in one block: reduce and write the output directly."""
    inv_hw = 1.0 / float(hw_total)

    def kernel(x_ref, o_ref):
        x = x_ref[...].astype(jnp.float32)                # (TR, HW)
        s = jnp.sum(x, axis=-1, keepdims=True)            # (TR, 1)
        o_ref[...] = (s * inv_hw).astype(o_ref.dtype)

    return kernel


def _multi_block_kernel(hw_total, thw, needs_mask):
    """Spatial axis tiled: accumulate (TR,1) f32 across the reduction grid axis."""
    inv_hw = 1.0 / float(hw_total)

    def kernel(x_ref, o_ref, acc_ref):
        k = pl.program_id(1)
        last = pl.num_programs(1) - 1

        @pl.when(k == 0)
        def _init():
            acc_ref[...] = jnp.zeros_like(acc_ref)

        x = x_ref[...].astype(jnp.float32)                # (TR, THW)

        if needs_mask:
            # Unmasked fast path for every full spatial block; only the final
            # (overhanging) block pays the compare+select, with a (1, THW) iota
            # that broadcasts over sublanes.
            @pl.when(k != last)
            def _full():
                acc_ref[...] += jnp.sum(x, axis=-1, keepdims=True)

            @pl.when(k == last)
            def _ragged():
                lane = jax.lax.broadcasted_iota(jnp.int32, (1, thw), 1)
                valid = (lane + k * thw) < hw_total
                acc_ref[...] += jnp.sum(jnp.where(valid, x, 0.0),
                                        axis=-1, keepdims=True)
        else:
            acc_ref[...] += jnp.sum(x, axis=-1, keepdims=True)

        @pl.when(k == last)
        def _finalize():
            o_ref[...] = (acc_ref[...] * inv_hw).astype(o_ref.dtype)

    return kernel


def global_avg_pool2d(x, *, vmem_limit_bytes=None, max_block_bytes=None):
    """(N, C, H, W) -> (N, C): mean over spatial dims (== adaptive_avg_pool2d(x, 1))."""
    N, C, H, W = x.shape
    HW = H * W
    R = N * C
    itemsize = jnp.dtype(x.dtype).itemsize

    x2 = x.reshape(R, HW)                     # free: NCHW is already row-major

    vmem_limit = int(vmem_limit_bytes or _default_vmem_limit_bytes())
    usable = (vmem_limit * 3) // 4            # headroom for pipeline bookkeeping

    # Lane-padded VMEM cost per block row: double-buffered input + double-buffered
    # (TR, 1) output (which also pads its lane dim to 128 in VMEM).
    in_row_pad = _round_up(HW, _LANES) * itemsize
    out_row_pad = _LANES * itemsize
    row_cost = 2 * in_row_pad + 2 * out_row_pad
    if max_block_bytes is not None:
        rows_vmem = int(max_block_bytes) // max(1, in_row_pad)
    else:
        rows_vmem = usable // row_cost

    if rows_vmem >= min(_SUBLANES, R):
        # Fast path: one spatial block per row -> no mask, no accumulator scratch.
        THW = HW
        needs_mask = False
        TR = min(R, rows_vmem)
    else:
        # HW too large for even 8 full rows per block: tile the spatial axis in
        # 128-lane multiples and accumulate across the sequential axis.
        TR = min(R, _SUBLANES)
        budget = int(max_block_bytes) if max_block_bytes is not None else usable // 2
        THW = _round_down(budget // (TR * itemsize), _LANES)
        THW = max(_LANES, min(THW, _round_up(HW, _LANES)))
        needs_mask = (HW % THW) != 0

    # Output block sublane rule: TR must be a multiple of 8 or equal to R.
    if TR < R:
        TR = max(_SUBLANES, _round_down(TR, _SUBLANES))
    else:
        TR = R

    grid_r = pl.cdiv(R, TR)
    # Give the "parallel" row axis at least 2 steps (v7x: 2 TensorCores per chip).
    if grid_r == 1 and R >= 2 * _SUBLANES:
        TR = _round_up(pl.cdiv(R, 2), _SUBLANES)
        grid_r = pl.cdiv(R, TR)

    grid_hw = pl.cdiv(HW, THW)

    if grid_hw == 1:
        kernel = _single_block_kernel(HW)
        scratch = []
    else:
        kernel = _multi_block_kernel(HW, THW, needs_mask)
        scratch = [pltpu.VMEM((TR, 1), jnp.float32)]

    cost = pl.CostEstimate(
        flops=R * HW + R,
        transcendentals=0,
        bytes_accessed=R * HW * itemsize + R * itemsize,
    )

    out = pl.pallas_call(
        kernel,
        out_shape=jax.ShapeDtypeStruct((R, 1), x.dtype),
        grid_spec=pltpu.PrefetchScalarGridSpec(
            num_scalar_prefetch=0,
            grid=(grid_r, grid_hw),
            in_specs=[pl.BlockSpec((TR, THW), lambda i, k: (i, k))],
            out_specs=pl.BlockSpec((TR, 1), lambda i, k: (i, 0)),
            scratch_shapes=scratch,
        ),
        compiler_params=pltpu.CompilerParams(
            dimension_semantics=("parallel", "arbitrary"),
            vmem_limit_bytes=vmem_limit,
        ),
        cost_estimate=cost,
    )(x2)

    return out.reshape(N, C)


if __name__ == "__main__":
    key = jax.random.PRNGKey(0)
    k1, k2, k3 = jax.random.split(key, 3)

    # Primary case.
    x = jax.random.normal(k1, (2, 4, 16, 16), dtype=jnp.float32)
    out = global_avg_pool2d(x)
    jax.block_until_ready(out)
    ref = jnp.mean(x, axis=(2, 3))
    assert out.shape == (2, 4), out.shape
    assert jnp.allclose(out, ref, atol=1e-5, rtol=1e-5)

    # ResNet-head-style 7x7 tail -> full-row fast path (no mask, no padding garbage).
    x2 = jax.random.normal(k2, (3, 16, 7, 7), dtype=jnp.float32)
    out2 = global_avg_pool2d(x2)
    jax.block_until_ready(out2)
    ref2 = jnp.mean(x2, axis=(2, 3))
    assert out2.shape == (3, 16), out2.shape
    assert jnp.allclose(out2, ref2, atol=1e-5, rtol=1e-5)

    # Force the spatial-tiling + masked-last-block fallback with a tiny block cap.
    x3 = jax.random.normal(k3, (2, 8, 20, 20), dtype=jnp.float32)
    out3 = global_avg_pool2d(x3, max_block_bytes=8 * 1024)
    jax.block_until_ready(out3)
    ref3 = jnp.mean(x3, axis=(2, 3))
    assert out3.shape == (2, 8), out3.shape
    assert jnp.allclose(out3, ref3, atol=1e-5, rtol=1e-5)

    print("KERNEL_OK")
</pallas_src>

<mosaic_0001>
module attributes {stable_mosaic.version = 11 : i64} {
  func.func @kernel(%arg0: i32, %arg1: i32, %arg2: memref<8x256xf32, #tpu.memory_space<vmem>>, %arg3: memref<8x1xf32, #tpu.memory_space<vmem>>) attributes {dimension_semantics = [#tpu.dimension_semantics<parallel>, #tpu.dimension_semantics<arbitrary>], iteration_bounds = array<i64: 1, 1>, scalar_prefetch = 0 : i64, scratch_operands = 0 : i64, tpu.core_type = #tpu.core_type<tc>, window_params = [{transform_indices = @transform_0, window_bounds = array<i64: 8, 256>}, {transform_indices = @transform_1, window_bounds = array<i64: 8, 1>}]} {
    %c0 = arith.constant 0 : index
    %c0_0 = arith.constant 0 : index
    %0 = vector.load %arg2[%c0, %c0_0] : memref<8x256xf32, #tpu.memory_space<vmem>>, vector<8x256xf32>
    %cst = arith.constant dense<0.000000e+00> : vector<8xf32>
    %1 = vector.multi_reduction <add>, %0, %cst [1] : vector<8x256xf32> to vector<8xf32>
    %2 = vector.shape_cast %1 : vector<8xf32> to vector<8x1xf32>
    %cst_1 = arith.constant 3.906250e-03 : f32
    %3 = vector.broadcast %cst_1 : f32 to vector<8x1xf32>
    %4 = arith.mulf %2, %3 : vector<8x1xf32>
    %c0_2 = arith.constant 0 : index
    %c0_3 = arith.constant 0 : index
    %5 = vector.load %arg3[%c0_2, %c0_3] : memref<8x1xf32, #tpu.memory_space<vmem>>, vector<8x1xf32>
    tpu.vector_store %arg3[%c0_2, %c0_3], %4 {strides = array<i32>} : memref<8x1xf32, #tpu.memory_space<vmem>>, vector<8x1xf32>,
    return
  }
  func.func @transform_0(%arg0: i32, %arg1: i32) -> (i32, i32) {
    %c0_i32 = arith.constant 0 : i32
    return %arg0, %arg1 : i32, i32
  }
  func.func @transform_1(%arg0: i32, %arg1: i32) -> (i32, i32) {
    %c0_i32 = arith.constant 0 : i32
    %c0_i32_0 = arith.constant 0 : i32
    return %arg0, %c0_i32 : i32, i32
  }
}

</mosaic_0001>

<bundles_post_ra>
// kernel: tpu_custom_call.1
= control target key start
LH: loop header
LB: loop body
LE: loop exit
PB: predicated region body
PF: predicated region fallthrough
CT: control target
= control target key end

     0   :  { %6 = vsyncpa [#allocation3], 0  ;;  %s62_s9 = smov [#allocation2]   ;;  %s79_s0 = inlined_call_operand.hbm [shape: f32[8,256], index: 0, kind: input, shape index: {}]   ;;  %s80_s1 = inlined_call_operand.vmem [shape: f32[8,1], index: 1, kind: output, shape index: {}]  }
   0x1   :  { %s12_s8 = sshll.u32 %s79_s0, 4  ;;  %s14_s10 = sshll.u32 %s62_s9, 4  ;;  %s13_s8 = int_to_ptr.hbm [resolvable:$true] %s12_s8  ;;  %s15_s10 = int_to_ptr.vmem [resolvable:$true] %s14_s10 }
   0x2   :  { %17 = dma.hbm_to_vmem [thread:$0]  %s13_s8, 256, %s15_s10, [#allocation3]  }
   0x3   :  { %60 = dma.done.wait [#allocation3], 256  }
   0x4   :  { %61 = vsyncadd [#allocation3], 4294967040  ;;  %v22_v0 = vld [vmem:[#allocation2] sm:$0xff]  ;;  %v23_v1 = vld [vmem:[#allocation2 + $0x8] sm:$0xff]  ;;  %vm28_vm0 = vcmask 7168  }
   0x5   :  { %v24_v2 = vadd.f32 %v23_v1, %v22_v0 }
   0x7   :  { %25 = vadd.xlane.f32.xlu0 %v24_v2 }
  0x7a   :  { %v26_v3 = vpop.xlane.xlu0 %25 }
  0x7b   :  { %v27_v4 = vmul.f32 0.00390625, %v26_v3 }
  0x7d   :  { %29 = vst.msk [vmem:[%s80_s1] sm:$0xff] %vm28_vm0, %v27_v4 }
  0x7e   :  { %34 = vsyncpa [#allocation3], 1 }

</bundles_post_ra>
